<compile_context>
chip_gen: v5e
topology: v5e:2x2
jax: 0.10.0
libtpu: 0.0.40
codegen_flags: <defaults>
</compile_context>

<pallas_src>
import functools
import math

import jax
import jax.numpy as jnp
from jax.experimental import pallas as pl
from jax.experimental.pallas import tpu as pltpu


def _soft_ce_kernel(pred_ref, centers_ref, cutoffs_ref, out_ref, *,
                    neg_half_inv_var: float, log_clamp: float,
                    lanes_are_batch: bool):
    """One batch tile.

    pred_ref:    (TB, L)  logits (any float dtype; cast to f32 on load)
    centers_ref: (TB, 1)  float32 gaussian centers
    cutoffs_ref: (TB, 1)  float32 cutoffs
    out_ref:     (TB, 1)  float32 per-row loss
    """
    pred = pred_ref[...].astype(jnp.float32)
    centers = centers_ref[...]
    cutoffs = cutoffs_ref[...]

    if lanes_are_batch:
        # L < 128 and TB >= 128: put the batch on the 128-lane axis so vregs are
        # fully dense; the XLU transpose slot is otherwise idle here.
        pred = jnp.transpose(pred)          # (L, TB)
        centers = jnp.transpose(centers)    # (1, TB)
        cutoffs = jnp.transpose(cutoffs)    # (1, TB)
        pos_axis = 0
    else:
        pos_axis = 1
    red_axis = pos_axis

    # Position index i (exactly representable in f32).
    idx = jax.lax.broadcasted_iota(jnp.int32, pred.shape, pos_axis)
    x = idx.astype(jnp.float32)

    # Gaussian labels with cutoff, normalized, clamped at 1e-5.
    d = x - centers
    g = jnp.exp(d * d * jnp.float32(neg_half_inv_var))
    g = jnp.where(x < cutoffs, g, jnp.float32(0.0))
    g_sum = jnp.sum(g, axis=red_axis, keepdims=True)
    g_sum = jnp.maximum(g_sum, jnp.float32(1e-30))      # guard all-zero label rows
    labels = jnp.maximum(g * (jnp.float32(1.0) / g_sum), jnp.float32(1e-5))

    # log(clamp(softmax(pred), 1e-5)) == max(log_softmax(pred), log(1e-5))
    m = jnp.max(pred, axis=red_axis, keepdims=True)
    lse = jnp.log(jnp.sum(jnp.exp(pred - m), axis=red_axis, keepdims=True)) + m
    logp = jnp.maximum(pred - lse, jnp.float32(log_clamp))

    loss = -jnp.sum(labels * logp, axis=red_axis, keepdims=True)
    if lanes_are_batch:
        loss = jnp.transpose(loss)          # back to (TB, 1)
    out_ref[...] = loss


def _pick_batch_tile(B: int, L: int, itemsize: int) -> int:
    """Rows of pred per tile.  Must be the full batch or a multiple of 8 (sublane)."""
    if B <= 8:
        return B                             # single tiny block (block dim == array dim)
    row_bytes = max(1, L * itemsize)
    # ~4 MiB per pred block buffer: double-buffered + f32 temporaries stays well
    # inside v7x's 64 MiB physical VMEM (and far from v5e/v6e limits).
    cap = max(8, ((4 << 20) // row_bytes) // 8 * 8)
    # ~B/4 rows per tile: >= 4 grid steps keeps the pipeline full and gives v7x
    # megacore at least two tiles per TensorCore.
    want = max(8, ((-(-B // 4)) + 7) // 8 * 8)
    return min(cap, want)


def _vmem_limit_bytes() -> int:
    try:
        phys = int(pltpu.get_tpu_info().vmem_capacity_bytes)
    except Exception:
        phys = 64 << 20
    # Leave headroom below physical; never go below the common 32 MiB default.
    return max(32 << 20, min(96 << 20, (phys * 3) // 4))


def soft_cross_entropy(pred, centers, cutoffs, *, std_dev_fraction: float):
    """pred: (B, L) float (f32/bf16); centers: (B,); cutoffs: (B,) -> scalar loss."""
    B, L = pred.shape
    std_dev = float(L) * float(std_dev_fraction)
    neg_half_inv_var = -0.5 / (std_dev * std_dev)

    centers_col = centers.astype(jnp.float32).reshape(B, 1)
    cutoffs_col = cutoffs.astype(jnp.float32).reshape(B, 1)

    itemsize = jnp.dtype(pred.dtype).itemsize
    tb = _pick_batch_tile(B, L, itemsize)
    num_tiles = pl.cdiv(B, tb)
    # Transposing to a batch-on-lanes layout only pays when the batch tile actually
    # fills the 128 lanes and L would otherwise leave vregs mostly empty.
    lanes_are_batch = (L < 128) and (tb >= 128)

    # TODO(synk): for very large length (L >= ~32k) add an inner "arbitrary" L-tiling
    # grid axis with running max / sum-exp accumulators in VMEM scratch so the pred
    # block stays <= ~4 MiB per buffer on v7x.

    per_row = pl.pallas_call(
        functools.partial(_soft_ce_kernel,
                          neg_half_inv_var=neg_half_inv_var,
                          log_clamp=math.log(1e-5),
                          lanes_are_batch=lanes_are_batch),
        out_shape=jax.ShapeDtypeStruct((B, 1), jnp.float32),
        grid_spec=pltpu.PrefetchScalarGridSpec(
            num_scalar_prefetch=0,
            grid=(num_tiles,),
            in_specs=[
                pl.BlockSpec((tb, L), lambda i: (i, 0)),
                pl.BlockSpec((tb, 1), lambda i: (i, 0)),
                pl.BlockSpec((tb, 1), lambda i: (i, 0)),
            ],
            out_specs=pl.BlockSpec((tb, 1), lambda i: (i, 0)),
        ),
        compiler_params=pltpu.CompilerParams(
            dimension_semantics=("parallel",),
            vmem_limit_bytes=_vmem_limit_bytes()),
    )(pred, centers_col, cutoffs_col)

    # Final mean over the batch in plain JAX (tiny).
    return jnp.mean(per_row)


def _reference_loss(pred, centers, cutoffs, *, length, std_dev_fraction):
    # Plain-JAX mirror of the PyTorch forward, for verification.
    B = pred.shape[0]
    x = jnp.broadcast_to(jnp.arange(length, dtype=jnp.float32)[None, :], (B, length))
    std_dev = length * std_dev_fraction
    labels = jnp.exp(-0.5 * ((x - centers[:, None].astype(jnp.float32)) / std_dev) ** 2)
    labels = jnp.where(x < cutoffs[:, None].astype(jnp.float32), labels, 0.0)
    labels = labels / jnp.sum(labels, axis=1, keepdims=True)
    labels = jnp.maximum(labels, 1e-5)
    p = jax.nn.softmax(pred, axis=1)
    p = jnp.maximum(p, 1e-5)
    return -jnp.mean(jnp.sum(labels * jnp.log(p), axis=1))


if __name__ == "__main__":
    LENGTH = 32             # module __init__ arg: length
    STD_DEV_FRACTION = 0.1  # module __init__ arg: std_dev_fraction
    B = 8                   # small batch

    key = jax.random.PRNGKey(0)
    k1, k2, k3 = jax.random.split(key, 3)
    pred = jax.random.normal(k1, (B, LENGTH), dtype=jnp.float32)
    centers = jax.random.randint(k2, (B,), 0, LENGTH, dtype=jnp.int32)
    # cutoffs >= 1 so the label sum is never zero (same implicit requirement as torch).
    cutoffs = jax.random.randint(k3, (B,), 1, LENGTH + 1, dtype=jnp.int32)

    loss = soft_cross_entropy(pred, centers, cutoffs,
                              std_dev_fraction=STD_DEV_FRACTION)
    loss = jax.block_until_ready(loss)

    ref = _reference_loss(pred, centers, cutoffs,
                          length=LENGTH, std_dev_fraction=STD_DEV_FRACTION)
    assert jnp.allclose(loss, ref, rtol=1e-4, atol=1e-5), (loss, ref)
    print("KERNEL_OK")
</pallas_src>

<mosaic_0001>
module attributes {stable_mosaic.version = 11 : i64} {
  func.func @_soft_ce_kernel(%arg0: i32, %arg1: memref<8x32xf32, #tpu.memory_space<vmem>>, %arg2: memref<8x1xf32, #tpu.memory_space<vmem>>, %arg3: memref<8x1xf32, #tpu.memory_space<vmem>>, %arg4: memref<8x1xf32, #tpu.memory_space<vmem>>) attributes {dimension_semantics = [#tpu.dimension_semantics<parallel>], iteration_bounds = array<i64: 1>, scalar_prefetch = 0 : i64, scratch_operands = 0 : i64, tpu.core_type = #tpu.core_type<tc>, window_params = [{transform_indices = @transform_0, window_bounds = array<i64: 8, 32>}, {transform_indices = @transform_1, window_bounds = array<i64: 8, 1>}, {transform_indices = @transform_2, window_bounds = array<i64: 8, 1>}, {transform_indices = @transform_3, window_bounds = array<i64: 8, 1>}]} {
    %c0 = arith.constant 0 : index
    %c0_0 = arith.constant 0 : index
    %0 = vector.load %arg1[%c0, %c0_0] : memref<8x32xf32, #tpu.memory_space<vmem>>, vector<8x32xf32>
    %c0_1 = arith.constant 0 : index
    %c0_2 = arith.constant 0 : index
    %1 = vector.load %arg2[%c0_1, %c0_2] : memref<8x1xf32, #tpu.memory_space<vmem>>, vector<8x1xf32>
    %c0_3 = arith.constant 0 : index
    %c0_4 = arith.constant 0 : index
    %2 = vector.load %arg3[%c0_3, %c0_4] : memref<8x1xf32, #tpu.memory_space<vmem>>, vector<8x1xf32>
    %3 = tpu.iota {dimensions = array<i32: 1>} : vector<8x32xi32>
    %4 = arith.sitofp %3 : vector<8x32xi32> to vector<8x32xf32>
    %5 = vector.broadcast %1 : vector<8x1xf32> to vector<8x32xf32>
    %6 = arith.subf %4, %5 : vector<8x32xf32>
    %7 = arith.mulf %6, %6 : vector<8x32xf32>
    %cst = arith.constant -0.048828125 : f32
    %8 = vector.broadcast %cst : f32 to vector<8x32xf32>
    %9 = arith.mulf %7, %8 : vector<8x32xf32>
    %10 = math.exp %9 : vector<8x32xf32>
    %11 = vector.broadcast %2 : vector<8x1xf32> to vector<8x32xf32>
    %12 = arith.cmpf olt, %4, %11 : vector<8x32xf32>
    %cst_5 = arith.constant 0.000000e+00 : f32
    %13 = vector.broadcast %cst_5 : f32 to vector<8x32xf32>
    %14 = arith.select %12, %10, %13 : vector<8x32xi1>, vector<8x32xf32>
    %cst_6 = arith.constant dense<0.000000e+00> : vector<8xf32>
    %15 = vector.multi_reduction <add>, %14, %cst_6 [1] : vector<8x32xf32> to vector<8xf32>
    %16 = vector.shape_cast %15 : vector<8xf32> to vector<8x1xf32>
    %cst_7 = arith.constant 1.000000e-30 : f32
    %17 = vector.broadcast %cst_7 : f32 to vector<8x1xf32>
    %18 = arith.maximumf %16, %17 : vector<8x1xf32>
    %cst_8 = arith.constant 1.000000e+00 : f32
    %19 = vector.broadcast %cst_8 : f32 to vector<8x1xf32>
    %20 = arith.divf %19, %18 : vector<8x1xf32>
    %21 = vector.broadcast %20 : vector<8x1xf32> to vector<8x32xf32>
    %22 = arith.mulf %14, %21 : vector<8x32xf32>
    %cst_9 = arith.constant 9.99999974E-6 : f32
    %23 = vector.broadcast %cst_9 : f32 to vector<8x32xf32>
    %24 = arith.maximumf %22, %23 : vector<8x32xf32>
    %cst_10 = arith.constant dense<0xFF800000> : vector<8xf32>
    %25 = vector.multi_reduction <maximumf>, %0, %cst_10 [1] : vector<8x32xf32> to vector<8xf32>
    %26 = vector.shape_cast %25 : vector<8xf32> to vector<8x1xf32>
    %27 = vector.broadcast %26 : vector<8x1xf32> to vector<8x32xf32>
    %28 = arith.subf %0, %27 : vector<8x32xf32>
    %29 = math.exp %28 : vector<8x32xf32>
    %cst_11 = arith.constant dense<0.000000e+00> : vector<8xf32>
    %30 = vector.multi_reduction <add>, %29, %cst_11 [1] : vector<8x32xf32> to vector<8xf32>
    %31 = vector.shape_cast %30 : vector<8xf32> to vector<8x1xf32>
    %32 = math.log %31 : vector<8x1xf32>
    %33 = arith.addf %32, %26 : vector<8x1xf32>
    %34 = vector.broadcast %33 : vector<8x1xf32> to vector<8x32xf32>
    %35 = arith.subf %0, %34 : vector<8x32xf32>
    %cst_12 = arith.constant -11.5129251 : f32
    %36 = vector.broadcast %cst_12 : f32 to vector<8x32xf32>
    %37 = arith.maximumf %35, %36 : vector<8x32xf32>
    %38 = arith.mulf %24, %37 : vector<8x32xf32>
    %cst_13 = arith.constant dense<0.000000e+00> : vector<8xf32>
    %39 = vector.multi_reduction <add>, %38, %cst_13 [1] : vector<8x32xf32> to vector<8xf32>
    %40 = vector.shape_cast %39 : vector<8xf32> to vector<8x1xf32>
    %cst_14 = arith.constant 0.000000e+00 : f32
    %41 = vector.broadcast %cst_14 : f32 to vector<8x1xf32>
    %42 = arith.subf %41, %40 : vector<8x1xf32>
    %c0_15 = arith.constant 0 : index
    %c0_16 = arith.constant 0 : index
    %43 = vector.load %arg4[%c0_15, %c0_16] : memref<8x1xf32, #tpu.memory_space<vmem>>, vector<8x1xf32>
    tpu.vector_store %arg4[%c0_15, %c0_16], %42 {strides = array<i32>} : memref<8x1xf32, #tpu.memory_space<vmem>>, vector<8x1xf32>,
    return
  }
  func.func @transform_0(%arg0: i32) -> (i32, i32) {
    %c0_i32 = arith.constant 0 : i32
    %c0_i32_0 = arith.constant 0 : i32
    return %arg0, %c0_i32 : i32, i32
  }
  func.func @transform_1(%arg0: i32) -> (i32, i32) {
    %c0_i32 = arith.constant 0 : i32
    %c0_i32_0 = arith.constant 0 : i32
    return %arg0, %c0_i32 : i32, i32
  }
  func.func @transform_2(%arg0: i32) -> (i32, i32) {
    %c0_i32 = arith.constant 0 : i32
    %c0_i32_0 = arith.constant 0 : i32
    return %arg0, %c0_i32 : i32, i32
  }
  func.func @transform_3(%arg0: i32) -> (i32, i32) {
    %c0_i32 = arith.constant 0 : i32
    %c0_i32_0 = arith.constant 0 : i32
    return %arg0, %c0_i32 : i32, i32
  }
}

</mosaic_0001>

<bundles_post_ra>
// kernel: tpu_custom_call.1
= control target key start
LH: loop header
LB: loop body
LE: loop exit
PB: predicated region body
PF: predicated region fallthrough
CT: control target
= control target key end

     0   :  { %v95_v0 = vmov 0   ;;  %vm37_vm0 = vcmask 261120   ;;  %v17_v5 = vlaneseq  ;;  %vm78_vm6 = vcmask 7168   ;;  %s132_s1 = inlined_call_operand.vmem [shape: f32[8,1], index: 1, kind: input, shape index: {}]   ;;  %s133_s2 = inlined_call_operand.vmem [shape: f32[8,1], index: 2, kind: input, shape index: {}]   ;;  %s134_s0 = inlined_call_operand.vmem [shape: f32[8,32], index: 0, kind: input, shape index: {}]   ;;  %s135_s3 = inlined_call_operand.vmem [shape: f32[8,1], index: 3, kind: output, shape index: {}]  }
   0x1   :  { %85 = vset.pattern.permute.xlu0 %v95_v0  ;;  %v15_v1 = vld [vmem:[%s132_s1] sm:$0xff]  ;;  %86 = vset.pattern.permute.xlu1 %v95_v0 }
   0x2   :  { %v16_v2 = vld [vmem:[%s133_s2] sm:$0xff]  ;;  %22 = vperm.xlu0 %85, %v15_v1   ;;  %v18_v6 = vand.u32 127, %v17_v5 }
   0x3   :  { %32 = vperm.xlu1 %86, %v16_v2   ;;  %v14_v3 = vld [vmem:[%s134_s0] sm:$0xff] }
   0x4   :  { %v59_v4 = vsel %vm37_vm0, %v14_v3, -inf  ;;  %v19_v7 = vcvt.s32.f32 %v18_v6 }
  0x2c   :  { %60 = vmax.xlane.f32.xlu0 %v59_v4 }
  0x74   :  { %v23_v8 = vpop.permute.xlu0 %22 }
  0x75   :  { %v25_v9 = vsub.f32 %v19_v7, %v23_v8  ;;  %v33_v13 = vpop.permute.xlu1 %32 }
  0x76   :  { %vm35_vm1 = vcmp.lt.f32.partialorder %v19_v7, %v33_v13 }
  0x77   :  { %v26_v10 = vmul.f32 %v25_v9, %v25_v9 }
  0x79   :  { %v27_v11 = vmul.f32 -0.048828125, %v26_v10 }
  0x7b   :  { %v28_v12 = vmul.f32 1.442695, %v27_v11 }
  0x7d   :  { %87 = vpow2.f32 %v28_v12 }
  0x83   :  { %v88_v14 = vpop.eup %87 }
  0x84   :  { %v36_v15 = vsel %vm35_vm1, %v88_v14, 0.0 }
  0x85   :  { %v38_v16 = vsel %vm37_vm0, %v36_v15, 0.0 }
  0x86   :  { %39 = vadd.xlane.f32.xlu1 %v38_v16 }
  0x9f   :  { %v61_v17 = vpop.xlane.xlu0 %60 }
  0xa0   :  { %v62_v18 = vsub.f32 %v14_v3, %v61_v17 }
  0xa2   :  { %v63_v19 = vmul.f32 1.442695, %v62_v18 }
  0xa4   :  { %89 = vpow2.f32 %v63_v19 }
  0xaa   :  { %v90_v20 = vpop.eup %89 }
  0xab   :  { %v65_v21 = vsel %vm37_vm0, %v90_v20, 0.0 }
  0xac   :  { %66 = vadd.xlane.f32.xlu2 %v65_v21 }
  0xf9   :  { %v40_v22 = vpop.xlane.xlu1 %39 }
  0xfa   :  { %v41_v23 = vmax.f32 %v40_v22, 1e-30 }
  0xfc   :  { %91 = vrcp.f32 %v41_v23  ;;  %v53_v30 = vand.u32 2147483648, %v41_v23  ;;  %vm47_vm3 = vweird.f32 %v41_v23  ;;  %v51_v31 = vand.u32 2147483647, %v41_v23 }
  0xfe   :  { %v54_v33 = vor.u32 1.1754944e-38, %v53_v30  ;;  %vm52_vm5 = vcmp.eq.f32.partialorder %v51_v31, 8.507059e+37 }
 0x102   :  { %v92_v24 = vpop.eup %91 }
 0x103   :  { %v43_v25 = vmul.f32 %v92_v24, %v41_v23  ;;  %vm48_vm2 = vweird.f32 %v92_v24 }
 0x104   :  { %vm49_vm4 = vmor %vm47_vm3, %vm48_vm2 }
 0x105   :  { %v44_v26 = vsub.f32 1.0, %v43_v25 }
 0x107   :  { %v45_v27 = vmul.f32 %v92_v24, %v44_v26 }
 0x109   :  { %v46_v29 = vadd.f32 %v92_v24, %v45_v27 }
 0x10b   :  { %v50_v32 = vsel %vm49_vm4, %v92_v24, %v46_v29 }
 0x10c   :  { %v55_v35 = vsel %vm52_vm5, %v54_v33, %v50_v32 }
 0x10d   :  { %v57_v38 = vmul.f32 %v55_v35, %v36_v15 }
 0x10f   :  { %v58_v40 = vmax.f32 %v57_v38, 1e-05 }
 0x11f   :  { %v67_v28 = vpop.xlane.xlu2 %66 }
 0x120   :  { %93 = vlog2.f32 %v67_v28 }
 0x126   :  { %v94_v34 = vpop.eup %93 }
 0x127   :  { %v69_v36 = vmul.f32 0.6931472, %v94_v34 }
 0x129   :  { %v70_v37 = vadd.f32 %v69_v36, %v61_v17 }
 0x12b   :  { %v71_v39 = vsub.f32 %v14_v3, %v70_v37 }
 0x12d   :  { %v72_v41 = vmax.f32 %v71_v39, -11.512925 }
 0x12f   :  { %v73_v42 = vmul.f32 %v72_v41, %v58_v40 }
 0x131   :  { %v74_v43 = vsel %vm37_vm0, %v73_v42, 0.0 }
 0x132   :  { %75 = vadd.xlane.f32.xlu2 %v74_v43 }
 0x1a5   :  { %v76_v44 = vpop.xlane.xlu2 %75 }
 0x1a6   :  { %v77_v45 = vsub.f32 0.0, %v76_v44 }
 0x1a8   :  { %79 = vst.msk [vmem:[%s135_s3] sm:$0xff] %vm78_vm6, %v77_v45 }

</bundles_post_ra>
